<compile_context>
chip_gen: v7x
topology: tpu7x:2x2x1
jax: 0.10.0
libtpu: 0.0.40
codegen_flags: <defaults>
</compile_context>

<pallas_src>
import functools

import jax
import jax.numpy as jnp
from jax.experimental import pallas as pl
from jax.experimental.pallas import tpu as pltpu


def _round_up(x, m):
    return -(-x // m) * m


# --------------------------------------------------------------------------
# Kernel: H-pool = (d-1) VPU adds over lane slices; W-pool = one MXU matmul.
# --------------------------------------------------------------------------
def _pool_kernel(x_ref, pw_ref, o_ref, *, d, W2):
    """x_ref: (tm, d*W2); pw_ref: (W2, Wo); o_ref: (tm, Wo)."""
    xs = x_ref[:, 0:W2].astype(jnp.float32)
    for di in range(1, d):                         # static, tiny loop (d == down_size)
        xs = xs + x_ref[:, di * W2:(di + 1) * W2].astype(jnp.float32)
    o_ref[...] = jnp.dot(
        xs, pw_ref[...], preferred_element_type=jnp.float32
    ).astype(o_ref.dtype)


# --------------------------------------------------------------------------
# Wrapper helpers
# --------------------------------------------------------------------------
def _vmem_capacity_bytes():
    try:
        cap = int(pltpu.get_tpu_info().vmem_capacity_bytes)
        if cap > 0:
            return cap
    except Exception:
        pass
    return 64 << 20                                # conservative (v7x per-TC VMEM)


def _pick_row_tile(M, in_row_bytes, out_row_bytes, vmem_capacity):
    """Rows per block, sized on *padded* per-row bytes incl. double buffering."""
    per_row = 2 * (in_row_bytes + out_row_bytes)   # x2 = double buffering
    budget = min(vmem_capacity // 4, 24 << 20)     # generous but with headroom
    cap = max(8, (budget // max(per_row, 1)) // 8 * 8)
    if M <= cap:
        # Everything fits in one block.  If there is enough work, still cut it
        # into ~8 big blocks so a dual-TC chip (v7x) shards the "parallel" grid
        # and each core keeps a DMA pipeline; tiny inputs stay one full block.
        if M >= 8 * 256:
            return _round_up(-(-M // 8), 8)
        return M                                   # full-dim exemption from (8,128)
    return cap                                     # multiple of 8; last block masked


def transition_down(x, down_size):
    """AvgPool2d(kernel_size=down_size, stride=down_size) on NCHW x; identity if falsy."""
    if not down_size:
        return x
    d = int(down_size)
    B, C, H, W = x.shape
    Ho, Wo = H // d, W // d
    if H != Ho * d or W != Wo * d:
        # PyTorch floor mode drops the remainder. NOTE: this crop + reshape is
        # NOT free (it materialises a cropped copy in HBM); typical EllSeg
        # shapes are divisible, so this branch is cold.
        # TODO(synk): clip inside the kernel via index_map/pl.ds on the
        # uncropped array to avoid the extra HBM round-trip on this cold path.
        x = x[:, :, :Ho * d, :Wo * d]
    W2 = Wo * d
    K = d * W2
    M = B * C * Ho

    a = x.reshape(M, K)                            # free row-major reshape (no data movement)

    # (W2, Wo) column-averaging matrix: pw[w, wo] = 1/d^2  iff  w // d == wo.
    pw = ((jnp.arange(W2) // d)[:, None] == jnp.arange(Wo)[None, :]
          ).astype(jnp.float32) * (1.0 / (d * d))

    itemsize = x.dtype.itemsize
    in_row_bytes = _round_up(K, 128) * itemsize    # lane-padded per-row footprint
    out_row_bytes = _round_up(Wo, 128) * itemsize
    vmem_cap = _vmem_capacity_bytes()
    tm = _pick_row_tile(M, in_row_bytes, out_row_bytes, vmem_cap)
    grid = (pl.cdiv(M, tm),)

    pw_bytes = 2 * _round_up(W2, 8) * _round_up(Wo, 128) * 4
    working = 2 * _round_up(tm, 16) * (in_row_bytes + out_row_bytes) + pw_bytes
    vmem_limit = int(min(max(working + (4 << 20), 16 << 20), (vmem_cap * 3) // 4))

    cost = pl.CostEstimate(
        flops=M * W2 * (d - 1) + 2 * M * W2 * Wo,
        transcendentals=0,
        bytes_accessed=M * K * itemsize + W2 * Wo * 4 + M * Wo * itemsize,
    )

    out = pl.pallas_call(
        functools.partial(_pool_kernel, d=d, W2=W2),
        out_shape=jax.ShapeDtypeStruct((M, Wo), x.dtype),
        grid=grid,
        in_specs=[
            pl.BlockSpec((tm, K), lambda i: (i, 0)),
            pl.BlockSpec((W2, Wo), lambda i: (0, 0)),
        ],
        out_specs=pl.BlockSpec((tm, Wo), lambda i: (i, 0)),
        compiler_params=pltpu.CompilerParams(
            dimension_semantics=("parallel",),
            vmem_limit_bytes=vmem_limit,
        ),
        cost_estimate=cost,
    )(a, pw)

    return out.reshape(B, C, Ho, Wo)


# --------------------------------------------------------------------------
if __name__ == "__main__":
    key = jax.random.PRNGKey(0)

    # Primary check (small shapes implied by the module).
    B, C, H, W = 2, 4, 16, 16
    d = 2
    x = jax.random.uniform(key, (B, C, H, W), dtype=jnp.float32)
    fwd = jax.jit(functools.partial(transition_down, down_size=d))
    y = fwd(x)
    jax.block_until_ready(y)
    ref = x.reshape(B, C, H // d, d, W // d, d).mean(axis=(3, 5))
    assert y.shape == (B, C, H // d, W // d)
    assert bool(jnp.all(jnp.isfinite(y)))
    assert jnp.allclose(y, ref, atol=1e-5, rtol=1e-5), float(jnp.max(jnp.abs(y - ref)))

    # Larger pooling window.
    y4 = jax.jit(functools.partial(transition_down, down_size=4))(x)
    jax.block_until_ready(y4)
    ref4 = x.reshape(B, C, H // 4, 4, W // 4, 4).mean(axis=(3, 5))
    assert jnp.allclose(y4, ref4, atol=1e-5, rtol=1e-5)

    # Non-divisible spatial dims (PyTorch floor mode drops the remainder).
    x2 = jax.random.uniform(jax.random.PRNGKey(1), (1, 3, 17, 19), dtype=jnp.float32)
    y2 = jax.jit(functools.partial(transition_down, down_size=2))(x2)
    jax.block_until_ready(y2)
    ref2 = x2[:, :, :16, :18].reshape(1, 3, 8, 2, 9, 2).mean(axis=(3, 5))
    assert jnp.allclose(y2, ref2, atol=1e-5, rtol=1e-5)

    # down_size falsy -> identity pass-through (matches the PyTorch `else: return x`).
    y_id = transition_down(x, 0)
    assert y_id.shape == x.shape and bool(jnp.all(y_id == x))

    print("KERNEL_OK")
</pallas_src>

<mosaic_0001>
module attributes {stable_mosaic.version = 11 : i64} {
  func.func @_pool_kernel(%arg0: i32, %arg1: memref<64x32xf32, #tpu.memory_space<vmem>>, %arg2: memref<16x8xf32, #tpu.memory_space<vmem>>, %arg3: memref<64x8xf32, #tpu.memory_space<vmem>>) attributes {dimension_semantics = [#tpu.dimension_semantics<parallel>], iteration_bounds = array<i64: 1>, scalar_prefetch = 0 : i64, scratch_operands = 0 : i64, tpu.core_type = #tpu.core_type<tc>, window_params = [{transform_indices = @transform_0, window_bounds = array<i64: 64, 32>}, {pipeline_mode = #tpu.pipeline_mode<synchronous>, transform_indices = @transform_1, window_bounds = array<i64: 16, 8>}, {transform_indices = @transform_2, window_bounds = array<i64: 64, 8>}]} {
    %c0 = arith.constant 0 : index
    %c0_0 = arith.constant 0 : index
    %0 = vector.load %arg1[%c0, %c0_0] : memref<64x32xf32, #tpu.memory_space<vmem>>, vector<64x16xf32>
    %c0_1 = arith.constant 0 : index
    %c16 = arith.constant 16 : index
    %1 = vector.load %arg1[%c0_1, %c16] : memref<64x32xf32, #tpu.memory_space<vmem>>, vector<64x16xf32>
    %2 = arith.addf %0, %1 : vector<64x16xf32>
    %c0_2 = arith.constant 0 : index
    %c0_3 = arith.constant 0 : index
    %3 = vector.load %arg2[%c0_2, %c0_3] : memref<16x8xf32, #tpu.memory_space<vmem>>, vector<16x8xf32>
    %cst = arith.constant dense<0.000000e+00> : vector<64x8xf32>
    %4 = tpu.matmul %2, %3, %cst {dimension_numbers = #tpu.dot_dimension_numbers<[1], [0], [0], [1], [0, 0, 1, 1], [], []>} : vector<64x16xf32>, vector<16x8xf32>, vector<64x8xf32> -> vector<64x8xf32>
    %c0_4 = arith.constant 0 : index
    %c0_5 = arith.constant 0 : index
    %5 = vector.load %arg3[%c0_4, %c0_5] : memref<64x8xf32, #tpu.memory_space<vmem>>, vector<64x8xf32>
    tpu.vector_store %arg3[%c0_4, %c0_5], %4 {strides = array<i32>} : memref<64x8xf32, #tpu.memory_space<vmem>>, vector<64x8xf32>,
    return
  }
  func.func @transform_0(%arg0: i32) -> (i32, i32) {
    %c0_i32 = arith.constant 0 : i32
    %c0_i32_0 = arith.constant 0 : i32
    return %arg0, %c0_i32 : i32, i32
  }
  func.func @transform_1(%arg0: i32) -> (i32, i32) {
    %c0_i32 = arith.constant 0 : i32
    %c0_i32_0 = arith.constant 0 : i32
    %c0_i32_1 = arith.constant 0 : i32
    return %c0_i32, %c0_i32_0 : i32, i32
  }
  func.func @transform_2(%arg0: i32) -> (i32, i32) {
    %c0_i32 = arith.constant 0 : i32
    %c0_i32_0 = arith.constant 0 : i32
    return %arg0, %c0_i32 : i32, i32
  }
}

</mosaic_0001>

<bundles_post_ra>
// kernel: transition_down.1
= control target key start
LH: loop header
LB: loop body
LE: loop exit
PB: predicated region body
PF: predicated region fallthrough
CT: control target
= control target key end

     0   :  { %s285_s13 = smov 112   ;;  %s362_s0 = inlined_call_operand.vmem [shape: f32[64,32], index: 0, kind: input, shape index: {}]   ;;  %s363_s1 = inlined_call_operand.vmem [shape: f32[16,8], index: 1, kind: input, shape index: {}]   ;;  %s364_s2 = inlined_call_operand.hbm [shape: f32[64,8], index: 2, kind: output, shape index: {}]  }
   0x1   :  { %v13_v0 = vld [vmem:[%s362_s0 + $0x8] sm:$0xff]  ;;  %v12_v1 = vld [vmem:[%s362_s0] sm:$0xff] }
   0x2   :  { %30 = vrot.lane.b32.xlu1 %v13_v0, %s285_s13  ;;  %28 = vrot.lane.b32.xlu0 %v12_v1, %s285_s13  ;;  %v17_v2 = vld [vmem:[%s362_s0 + $0x28] sm:$0xff]  ;;  %v16_v3 = vld [vmem:[%s362_s0 + $0x20] sm:$0xff] }
   0x3   :  { %v60_v4 = vld [vmem:[%s363_s1] sm:$0xff]  ;;  %v61_v5 = vld [vmem:[%s363_s1 + $0x8] sm:$0xff] }
   0x4   :  { %7 = vsyncpa [#allocation3], 0  ;;  %v251_v6 = vpack.c.bf16 %v61_v5, %v60_v4  ;;  %v18_v7 = vld [vmem:[%s362_s0 + $0x30] sm:$0xff]  ;;  %v19_v9 = vld [vmem:[%s362_s0 + $0x38] sm:$0xff]  ;;  %vm62_vm0 = vcmask 130048   ;;  %vm192_vm1 = vcmask 64512  }
   0x5   :  { %v14_v8 = vld [vmem:[%s362_s0 + $0x10] sm:$0xff]  ;;  %v15_v10 = vld [vmem:[%s362_s0 + $0x18] sm:$0xff]  ;;  %s286_s0 = smov [#allocation2]  }
   0x6   :  { %38 = vrot.lane.b32.xlu1 %v17_v2, %s285_s13  ;;  %36 = vrot.lane.b32.xlu0 %v16_v3, %s285_s13  ;;  %s206_s29 = sshll.u32 %s286_s0, 4  ;;  %s207_s29 = int_to_ptr.vmem [resolvable:$true] %s206_s29 }
   0x7   :  { %252 = vmatprep.subr.bf16.mxu0 %v251_v6  ;;  %255 = vmatprep.subr.bf16.mxu1 %v251_v6  ;;  %s261_s30 = scalar_lea.vmem %s207_s29, 1024  ;;  %p266_p1 = scmp.lt.s32.totalorder %s207_s29, %s207_s29 }
   0x8   :  { %254 = vmatpush3.bf16.msra.mxu0 %v251_v6  ;;  %256 = vmatpush3.bf16.msra.mxu1 %v251_v6  ;;  %p262_p0 = scmp.ne.s32.totalorder %s207_s29, %s261_s30  ;;  %p267_p2 = scmp.lt.s32.totalorder %s261_s30, %s261_s30 }
   0xa   :  { %40 = vrot.lane.b32.xlu1 %v18_v7, %s285_s13  ;;  %32 = vrot.lane.b32.xlu0 %v14_v8, %s285_s13  ;;  %p268_p3 = por %p267_p2, %p266_p1 }
   0xc   :  { %p269_p4 = pnand %p268_p3, %p262_p0 }
   0xe   :  { %42 = vrot.lane.b32.xlu1 %v19_v9, %s285_s13  ;;  %34 = vrot.lane.b32.xlu0 %v15_v10, %s285_s13 }
  0x74   :  { %v31_v11 = vpop.permute.xlu1 %30  ;;  %v29_v12 = vpop.permute.xlu0 %28 }
  0x75   :  { %v53_v13 = vadd.f32 %v31_v11, %v13_v0  ;;  %v52_v14 = vadd.f32 %v29_v12, %v12_v1 }
  0x77   :  { %239 = vmatprep.mubr.msk.f32.mxu0 %vm62_vm0, %v52_v14 }
  0x78   :  { %v39_v15 = vpop.permute.xlu1 %38  ;;  %240 = vmatmul.mubr.msk.f32.vlgmr.msra.gmra.mrb[0].mxu0 %vm62_vm0, %v53_v13  ;;  %v37_v16 = vpop.permute.xlu0 %36 }
  0x79   :  { %v57_v17 = vadd.f32 %v39_v15, %v17_v2  ;;  %v56_v18 = vadd.f32 %v37_v16, %v16_v3 }
  0x7b   :  { %245 = vmatprep.mubr.msk.f32.mxu1 %vm62_vm0, %v56_v18 }
  0x7c   :  { %v41_v19 = vpop.permute.xlu1 %40  ;;  %246 = vmatmul.mubr.msk.f32.vlgmr.msra.gmra.mrb[0].mxu1 %vm62_vm0, %v57_v17  ;;  %v33_v20 = vpop.permute.xlu0 %32 }
  0x7d   :  { %v58_v21 = vadd.f32 %v41_v19, %v18_v7  ;;  %v54_v22 = vadd.f32 %v33_v20, %v14_v8 }
  0x7f   :  { %242 = vmatprep.mubr.msk.f32.mxu0 %vm62_vm0, %v54_v22  ;;  %248 = vmatprep.mubr.msk.f32.mxu1 %vm62_vm0, %v58_v21 }
  0x80   :  { %v43_v23 = vpop.permute.xlu1 %42  ;;  %v35_v24 = vpop.permute.xlu0 %34 }
  0x81   :  { %v59_v25 = vadd.f32 %v43_v23, %v19_v9  ;;  %v55_v26 = vadd.f32 %v35_v24, %v15_v10 }
  0x83   :  { %243 = vmatmul.mubr.msk.f32.gmra.mrb[2].mxu0 %vm62_vm0, %v55_v26  ;;  %249 = vmatmul.mubr.msk.f32.gmra.mrb[2].mxu1 %vm62_vm0, %v59_v25 }
 0x14b   :  { %v241_v27 = vpop.f32.mrb[0].mxu0 }
 0x14c   :  { %194 = vst.msk [vmem:[#allocation2 + $0x8] sm:$0xff] %vm192_vm1, %v241_v27  ;;  %v153_v28 = vpop.f32.mrb[1].mxu0 }
 0x14d   :  { %193 = vst.msk [vmem:[#allocation2] sm:$0xff] %vm192_vm1, %v153_v28 }
 0x14f   :  { %v247_v29 = vpop.f32.mrb[0].mxu1 }
 0x150   :  { %198 = vst.msk [vmem:[#allocation2 + $0x28] sm:$0xff] %vm192_vm1, %v247_v29  ;;  %v173_v30 = vpop.f32.mrb[1].mxu1 }
 0x151   :  { %197 = vst.msk [vmem:[#allocation2 + $0x20] sm:$0xff] %vm192_vm1, %v173_v30 }
 0x156   :  { %v244_v31 = vpop.f32.mrb[2].mxu0  ;;  %v250_v32 = vpop.f32.mrb[2].mxu1 }
 0x157   :  { %196 = vst.msk [vmem:[#allocation2 + $0x18] sm:$0xff] %vm192_vm1, %v244_v31  ;;  %200 = vst.msk [vmem:[#allocation2 + $0x38] sm:$0xff] %vm192_vm1, %v250_v32  ;;  %v163_v33 = vpop.f32.mrb[3].mxu0  ;;  %v183_v34 = vpop.f32.mrb[3].mxu1 }
 0x158   :  { %195 = vst.msk [vmem:[#allocation2 + $0x10] sm:$0xff] %vm192_vm1, %v163_v33  ;;  %199 = vst.msk [vmem:[#allocation2 + $0x30] sm:$0xff] %vm192_vm1, %v183_v34 }
 0x159   :  { %272 = shalt.err (!%p269_p4)
}
 0x15a   :  { %s273_s5 = scalar_lea.hbm %s364_s2, 1024 }
 0x15b   :  { %p274_p5 = scmp.ne.s32.totalorder %s364_s2, %s273_s5  ;;  %p277_p6 = scmp.lt.u32.totalorder %s273_s5, %s364_s2 }
 0x15d   :  { %p279_p7 = pnand %p277_p6, %p274_p5 }
 0x15f   :  { %282 = shalt.err (!%p279_p7)
}
 0x160   :  { %s287_s10 = smov 128   ;;  %s288_s11 = smov 8  }
 0x161   :  { %212 = dma.vmem_to_hbm [thread:$0]  %s207_s29, 1024, %s364_s2, [#allocation3], %s287_s10, %s287_s10, %s288_s11  }
 0x162   :  { %283 = dma.done.wait [#allocation3], 1024  }
 0x163   :  { %284 = vsyncadd [#allocation3], 4294966272 }
 0x164   :  { %216 = vsyncpa [#allocation3], 1 }

</bundles_post_ra>
